<compile_context>
chip_gen: v5e
topology: v5e:2x2
jax: 0.10.0
libtpu: 0.0.40
codegen_flags: <defaults>
</compile_context>

<pallas_src>
import functools

import jax
import jax.numpy as jnp
from jax.experimental import pallas as pl
from jax.experimental.pallas import tpu as pltpu

_LANE = 128


def _round_up(x, m):
    return (x + m - 1) // m * m


def _pick_batch_block(B, T, T_pad, T_out, C_in, tc_out, K, itemsize,
                      budget_bytes=6 << 20):
    """Largest divisor of B whose per-step working set fits a modest VMEM budget."""
    per_b = (2 * T * C_in * itemsize           # x tile (double-buffered)
             + T_pad * C_in * itemsize         # in-kernel padded scratch
             + T_out * K * C_in * itemsize     # im2col patches value
             + T_out * tc_out * 4              # f32 accumulator
             + 2 * T_out * tc_out * itemsize)  # output tile (double-buffered)
    per_b = max(1, per_b)
    cap = max(1, min(B, budget_bytes // per_b))
    for d in range(cap, 0, -1):
        if B % d == 0:
            return d
    return 1


def _conv1d_kernel(x_ref, w_ref, b_ref, o_ref, *scratch,
                   K, stride, padding, T, T_out):
    # x_ref:    (B_blk, T, C_in)             input tile (unpadded)
    # w_ref:    (K*C_in, TC_out)             fused im2col weights
    # b_ref:    (1, TC_out)                  bias (f32)
    # o_ref:    (B_blk, T_out, TC_out)       lane-dense output tile
    # scratch:  (xpad_ref,) iff padding > 0  -> (B_blk, T + 2*padding, C_in)
    B_blk, _, C_in = x_ref.shape

    if padding > 0:
        (xpad_ref,) = scratch
        # In-kernel zero padding along time (avoids padding x in HBM).
        halo = jnp.zeros((B_blk, padding, C_in), dtype=xpad_ref.dtype)
        xpad_ref[:, :padding, :] = halo
        xpad_ref[:, padding + T:, :] = halo
        xpad_ref[:, padding:padding + T, :] = x_ref[...]
        src = xpad_ref
    else:
        src = x_ref

    # Fused im2col over the whole batch block: K strided sublane views,
    # stacked along the channel (lane) axis.
    taps = []
    for k in range(K):                               # static unroll (K small)
        if stride == 1:
            sl = pl.ds(k, T_out)
        else:
            sl = pl.ds(k, T_out, stride=stride)
        taps.append(src[:, sl, :])                   # (B_blk, T_out, C_in)
    patches = jnp.concatenate(taps, axis=-1) if K > 1 else taps[0]
    # patches: (B_blk, T_out, K*C_in)

    # One MXU matmul: contract K*C_in; batch + time fold into the row dim.
    acc = jax.lax.dot_general(
        patches, w_ref[...],
        dimension_numbers=(((2,), (0,)), ((), ())),
        preferred_element_type=jnp.float32)          # (B_blk, T_out, TC_out)
    acc = acc + b_ref[...]                           # bias add in f32 (v5e-safe)
    o_ref[...] = acc.astype(o_ref.dtype)


def cnn_encoder_forward(x, statics, weight, bias, *, stride, padding):
    """x: (B, T, C_in); weight: (C_out, C_in, K) [PyTorch layout]; bias: (C_out,)."""
    del statics  # unused, matches the PyTorch forward
    B, T, C_in = x.shape
    C_out, _, K = weight.shape
    T_out = (T + 2 * padding - K) // stride + 1
    T_pad = T + 2 * padding

    # Lane-dense / tiled output channels.
    tc_out = _round_up(C_out, _LANE) if C_out <= 256 else 256
    c_out_pad = _round_up(C_out, tc_out)
    n_cout_tiles = c_out_pad // tc_out

    # Batch blocking (fold the batch block into matmul rows).
    b_blk = _pick_batch_block(B, T, T_pad, T_out, C_in, tc_out, K,
                              x.dtype.itemsize)
    n_b_tiles = B // b_blk

    # Weight: (C_out, C_in, K) -> (K, C_in, C_out) -> (K*C_in, C_out)
    # (tap-major, channel-minor: matches the in-kernel im2col concat order),
    # then pad C_out up to the lane-tiled width.
    w = jnp.transpose(weight, (2, 1, 0)).reshape(K * C_in, C_out)
    if c_out_pad != C_out:
        w = jnp.pad(w, ((0, 0), (0, c_out_pad - C_out)))
    b2 = bias.astype(jnp.float32)
    if c_out_pad != C_out:
        b2 = jnp.pad(b2, (0, c_out_pad - C_out))
    b2 = b2.reshape(1, c_out_pad)

    kernel = functools.partial(_conv1d_kernel, K=K, stride=stride,
                               padding=padding, T=T, T_out=T_out)

    scratch_shapes = []
    if padding > 0:
        scratch_shapes.append(pltpu.VMEM((b_blk, T_pad, C_in), x.dtype))

    out3 = pl.pallas_call(
        kernel,
        out_shape=jax.ShapeDtypeStruct((B, T_out, c_out_pad), x.dtype),
        grid_spec=pltpu.PrefetchScalarGridSpec(
            num_scalar_prefetch=0,
            grid=(n_b_tiles, n_cout_tiles),
            in_specs=[
                pl.BlockSpec((b_blk, T, C_in), lambda i, j: (i, 0, 0)),
                pl.BlockSpec((K * C_in, tc_out), lambda i, j: (0, j)),
                pl.BlockSpec((1, tc_out), lambda i, j: (0, j)),
            ],
            out_specs=pl.BlockSpec((b_blk, T_out, tc_out),
                                   lambda i, j: (i, 0, j)),
            scratch_shapes=scratch_shapes,
        ),
        compiler_params=pltpu.CompilerParams(
            dimension_semantics=("parallel", "parallel"),
            vmem_limit_bytes=32 * 1024 * 1024,
        ),
    )(x, w, b2)

    if c_out_pad != C_out:
        out3 = out3[:, :, :C_out]
    return out3


def _reference(x, weight, bias, *, stride, padding):
    # Pure-JAX reference mirroring torch.nn.Conv1d on (B, C_in, T).
    xc = jnp.transpose(x, (0, 2, 1))              # (B, C_in, T)
    y = jax.lax.conv_general_dilated(
        xc, weight, window_strides=(stride,), padding=[(padding, padding)],
        dimension_numbers=("NCH", "OIH", "NCH"))
    y = y + bias[None, :, None]
    return jnp.transpose(y, (0, 2, 1))            # (B, T_out, C_out)


if __name__ == "__main__":
    # Small shapes implied by the module: sequence input (B, T, C_in).
    B, T, C_in = 2, 16, 4
    C_out, K, stride, padding = 8, 3, 1, 1

    key = jax.random.PRNGKey(0)
    kx, ks, kw, kb = jax.random.split(key, 4)
    x = jax.random.normal(kx, (B, T, C_in), dtype=jnp.float32)
    statics = jax.random.normal(ks, (B, 5), dtype=jnp.float32)  # unused by forward

    # Deterministic parameter init (uniform, like torch's default scale).
    fan_in = C_in * K
    bound = 1.0 / (fan_in ** 0.5)
    weight = jax.random.uniform(kw, (C_out, C_in, K), jnp.float32, -bound, bound)
    bias = jax.random.uniform(kb, (C_out,), jnp.float32, -bound, bound)

    out = cnn_encoder_forward(x, statics, weight, bias,
                              stride=stride, padding=padding)
    out = jax.block_until_ready(out)

    ref = _reference(x, weight, bias, stride=stride, padding=padding)
    T_out = (T + 2 * padding - K) // stride + 1
    assert out.shape == (B, T_out, C_out)
    assert jnp.allclose(out, ref, atol=1e-5, rtol=1e-5), "mismatch vs reference"

    print("KERNEL_OK")
</pallas_src>

<mosaic_0001>
module attributes {stable_mosaic.version = 11 : i64} {
  func.func @_conv1d_kernel(%arg0: i32, %arg1: i32, %arg2: memref<2x16x4xf32, #tpu.memory_space<vmem>>, %arg3: memref<12x128xf32, #tpu.memory_space<vmem>>, %arg4: memref<1x128xf32, #tpu.memory_space<vmem>>, %arg5: memref<2x16x128xf32, #tpu.memory_space<vmem>>, %arg6: memref<2x18x4xf32, #tpu.memory_space<vmem>>) attributes {dimension_semantics = [#tpu.dimension_semantics<parallel>, #tpu.dimension_semantics<parallel>], iteration_bounds = array<i64: 1, 1>, scalar_prefetch = 0 : i64, scratch_operands = 1 : i64, tpu.core_type = #tpu.core_type<tc>, window_params = [{transform_indices = @transform_0, window_bounds = array<i64: 2, 16, 4>}, {transform_indices = @transform_1, window_bounds = array<i64: 12, 128>}, {transform_indices = @transform_2, window_bounds = array<i64: 1, 128>}, {transform_indices = @transform_3, window_bounds = array<i64: 2, 16, 128>}]} {
    %cst = arith.constant 0.000000e+00 : f32
    %0 = vector.broadcast %cst : f32 to vector<2x1x4xf32>
    %c0 = arith.constant 0 : index
    %c0_0 = arith.constant 0 : index
    %c0_1 = arith.constant 0 : index
    %1 = vector.load %arg6[%c0, %c0_0, %c0_1] : memref<2x18x4xf32, #tpu.memory_space<vmem>>, vector<2x1x4xf32>
    tpu.vector_store %arg6[%c0, %c0_0, %c0_1], %0 {strides = array<i32>} : memref<2x18x4xf32, #tpu.memory_space<vmem>>, vector<2x1x4xf32>,
    %c0_2 = arith.constant 0 : index
    %c17 = arith.constant 17 : index
    %c0_3 = arith.constant 0 : index
    %2 = vector.load %arg6[%c0_2, %c17, %c0_3] : memref<2x18x4xf32, #tpu.memory_space<vmem>>, vector<2x1x4xf32>
    tpu.vector_store %arg6[%c0_2, %c17, %c0_3], %0 {strides = array<i32>} : memref<2x18x4xf32, #tpu.memory_space<vmem>>, vector<2x1x4xf32>,
    %c0_4 = arith.constant 0 : index
    %c0_5 = arith.constant 0 : index
    %c0_6 = arith.constant 0 : index
    %3 = vector.load %arg2[%c0_4, %c0_5, %c0_6] : memref<2x16x4xf32, #tpu.memory_space<vmem>>, vector<2x16x4xf32>
    %c0_7 = arith.constant 0 : index
    %c1 = arith.constant 1 : index
    %c0_8 = arith.constant 0 : index
    %4 = vector.load %arg6[%c0_7, %c1, %c0_8] : memref<2x18x4xf32, #tpu.memory_space<vmem>>, vector<2x16x4xf32>
    tpu.vector_store %arg6[%c0_7, %c1, %c0_8], %3 {strides = array<i32>} : memref<2x18x4xf32, #tpu.memory_space<vmem>>, vector<2x16x4xf32>,
    %c0_9 = arith.constant 0 : index
    %c0_10 = arith.constant 0 : index
    %c0_11 = arith.constant 0 : index
    %5 = vector.load %arg6[%c0_9, %c0_10, %c0_11] : memref<2x18x4xf32, #tpu.memory_space<vmem>>, vector<2x16x4xf32>
    %c0_12 = arith.constant 0 : index
    %c1_13 = arith.constant 1 : index
    %c0_14 = arith.constant 0 : index
    %6 = vector.load %arg6[%c0_12, %c1_13, %c0_14] : memref<2x18x4xf32, #tpu.memory_space<vmem>>, vector<2x16x4xf32>
    %c0_15 = arith.constant 0 : index
    %c2 = arith.constant 2 : index
    %c0_16 = arith.constant 0 : index
    %7 = vector.load %arg6[%c0_15, %c2, %c0_16] : memref<2x18x4xf32, #tpu.memory_space<vmem>>, vector<2x16x4xf32>
    %8 = tpu.concatenate %5, %6, %7 in 2 : vector<2x16x4xf32>, vector<2x16x4xf32>, vector<2x16x4xf32> -> vector<2x16x12xf32>
    %c0_17 = arith.constant 0 : index
    %c0_18 = arith.constant 0 : index
    %9 = vector.load %arg3[%c0_17, %c0_18] : memref<12x128xf32, #tpu.memory_space<vmem>>, vector<12x128xf32>
    %cst_19 = arith.constant dense<0.000000e+00> : vector<2x16x128xf32>
    %10 = tpu.matmul %8, %9, %cst_19 {dimension_numbers = #tpu.dot_dimension_numbers<[2], [0], [0, 1], [1], [0, 0, 0, 1, 1, 1], [], []>} : vector<2x16x12xf32>, vector<12x128xf32>, vector<2x16x128xf32> -> vector<2x16x128xf32>
    %c0_20 = arith.constant 0 : index
    %c0_21 = arith.constant 0 : index
    %11 = vector.load %arg4[%c0_20, %c0_21] : memref<1x128xf32, #tpu.memory_space<vmem>>, vector<1x128xf32>
    %12 = vector.shape_cast %11 : vector<1x128xf32> to vector<1x1x128xf32>
    %13 = vector.broadcast %12 : vector<1x1x128xf32> to vector<2x16x128xf32>
    %14 = arith.addf %10, %13 : vector<2x16x128xf32>
    %c0_22 = arith.constant 0 : index
    %c0_23 = arith.constant 0 : index
    %c0_24 = arith.constant 0 : index
    %15 = vector.load %arg5[%c0_22, %c0_23, %c0_24] : memref<2x16x128xf32, #tpu.memory_space<vmem>>, vector<2x16x128xf32>
    tpu.vector_store %arg5[%c0_22, %c0_23, %c0_24], %14 {strides = array<i32>} : memref<2x16x128xf32, #tpu.memory_space<vmem>>, vector<2x16x128xf32>,
    return
  }
  func.func @transform_0(%arg0: i32, %arg1: i32) -> (i32, i32, i32) {
    %c0_i32 = arith.constant 0 : i32
    %c0_i32_0 = arith.constant 0 : i32
    %c0_i32_1 = arith.constant 0 : i32
    return %arg0, %c0_i32, %c0_i32_0 : i32, i32, i32
  }
  func.func @transform_1(%arg0: i32, %arg1: i32) -> (i32, i32) {
    %c0_i32 = arith.constant 0 : i32
    %c0_i32_0 = arith.constant 0 : i32
    return %c0_i32, %arg1 : i32, i32
  }
  func.func @transform_2(%arg0: i32, %arg1: i32) -> (i32, i32) {
    %c0_i32 = arith.constant 0 : i32
    %c0_i32_0 = arith.constant 0 : i32
    return %c0_i32, %arg1 : i32, i32
  }
  func.func @transform_3(%arg0: i32, %arg1: i32) -> (i32, i32, i32) {
    %c0_i32 = arith.constant 0 : i32
    %c0_i32_0 = arith.constant 0 : i32
    return %arg0, %c0_i32, %arg1 : i32, i32, i32
  }
}

</mosaic_0001>

<bundles_post_ra>
// kernel: tpu_custom_call.1
= control target key start
LH: loop header
LB: loop body
LE: loop exit
PB: predicated region body
PF: predicated region fallthrough
CT: control target
= control target key end

     0   :  { %vm24_vm0 = vcmask 31744   ;;  %vm15_vm1 = vcmask 24576   ;;  %vm101_vm2 = vcmask 1043456   ;;  %s273_s0 = inlined_call_operand.vmem [shape: f32[2,16,4], index: 0, kind: input, shape index: {}]   ;;  %s274_s1 = inlined_call_operand.vmem [shape: f32[12,128], index: 1, kind: input, shape index: {}]   ;;  %s275_s2 = inlined_call_operand.vmem [shape: f32[1,128], index: 2, kind: input, shape index: {}]   ;;  %s276_s3 = inlined_call_operand.hbm [shape: f32[2,16,128], index: 3, kind: output, shape index: {}]  }
   0x1   :  { %v22_v0 = vld [vmem:[%s273_s0 + $0x10] sm:$0xff]  ;;  %v23_v1 = vld [vmem:[%s273_s0 + $0x18] sm:$0xff]  ;;  %v83_v2 = vld [vmem:[%s274_s1 + $0x8] sm:$0xf] }
   0x2   :  { %27 = vst.msk [vmem:[#allocation2 + $0x19] sm:$0xff] %vm24_vm0, %v22_v0 }
   0x3   :  { %28 = vst.msk [vmem:[#allocation2 + $0x21] sm:$0xff] %vm24_vm0, %v23_v1 }
   0x4   :  { %8 = vsyncpa [#allocation4], 0  ;;  %v199_v3 = vmov 0.0   ;;  %162 = vmatpush.msk.msra.mxu2 %vm101_vm2, %v83_v2  ;;  %163 = vmatpush.msk.msra.mxu3 %vm101_vm2, %v83_v2  ;;  %v20_v4 = vld [vmem:[%s273_s0] sm:$0xff]  ;;  %v21_v5 = vld [vmem:[%s273_s0 + $0x8] sm:$0xff]  ;;  %s200_s22 = smov 4  }
   0x5   :  { %19 = vst.msk [vmem:[#allocation2 + $0x29] sm:$0x1] %vm15_vm1, %v199_v3  ;;  %156 = vmatpush.msk.msra.mxu0 %vm101_vm2, %v83_v2  ;;  %161 = vmatpush.msk.msra.mxu1 %vm101_vm2, %v83_v2  ;;  %s201_s23 = smov 8   ;;  %v82_v14 = vld [vmem:[%s274_s1] sm:$0xff]  ;;  %vm77_vm3 = vcmask 64512   ;;  %vm88_vm4 = vcmask 97280  }
   0x6   :  { %16 = vst.msk [vmem:[#allocation2] sm:$0x1] %vm15_vm1, %v199_v3  ;;  %165 = vmatpush.msra.mxu2 %v82_v14  ;;  %166 = vmatpush.msra.mxu3 %v82_v14  ;;  %v172_v35 = vld [vmem:[%s275_s2] ss:$0 sm:$0xff]  ;;  %s202_s26 = smov [#allocation3]   ;;  %s144_s30 = sshll.u32 %s276_s3, 4  ;;  %s145_s30 = int_to_ptr.hbm [resolvable:$true] %s144_s30 }
   0x7   :  { %17 = vst.msk [vmem:[#allocation2 + $0x18] sm:$0x1] %vm15_vm1, %v199_v3  ;;  %120 = vmatpush.msra.mxu0 %v82_v14  ;;  %164 = vmatpush.msra.mxu1 %v82_v14  ;;  %s142_s27 = sshll.u32 %s202_s26, 4  ;;  %s203_s2 = smov 128   ;;  %s143_s27 = int_to_ptr.vmem [resolvable:$true] %s142_s27 }
   0x8   :  { %18 = vst.msk [vmem:[#allocation2 + $0x11] sm:$0x1] %vm15_vm1, %v199_v3 }
   0x9   :  { %25 = vst.msk [vmem:[#allocation2 + $0x1] sm:$0xff] %vm24_vm0, %v20_v4  ;;  %v35_v6 = vld [vmem:[#allocation2 + $0x19] sm:$0xff] }
   0xa   :  { %26 = vst.msk [vmem:[#allocation2 + $0x9] sm:$0xff] %vm24_vm0, %v21_v5  ;;  %v39_v7 = vld [vmem:[#allocation2 + $0x1a] sm:$0xff]  ;;  %49 = vrot.lane.b32.xlu0 %v35_v6, %s200_s22 }
   0xb   :  { %65 = vrot.lane.b32.xlu1 %v39_v7, %s201_s23  ;;  %v36_v8 = vld [vmem:[#allocation2 + $0x21] sm:$0xff] }
   0xc   :  { %v40_v10 = vld [vmem:[#allocation2 + $0x22] sm:$0xff] }
   0xd   :  { %v32_v21 = vld [vmem:[#allocation2 + $0x20] sm:$0xff] }
   0xe   :  { %v31_v15 = vld [vmem:[#allocation2 + $0x18] sm:$0xff] }
  0x10   :  { %v33_v9 = vld [vmem:[#allocation2 + $0x1] sm:$0xff] }
  0x11   :  { %45 = vrot.lane.b32.xlu2 %v33_v9, %s200_s22  ;;  %v34_v11 = vld [vmem:[#allocation2 + $0x9] sm:$0xff]  ;;  %v29_v28 = vld [vmem:[#allocation2] sm:$0xff] }
  0x12   :  { %51 = vrot.lane.b32.xlu0 %v36_v8, %s200_s22  ;;  %v37_v12 = vld [vmem:[#allocation2 + $0x2] sm:$0xff]  ;;  %v38_v13 = vld [vmem:[#allocation2 + $0xa] sm:$0xff] }
  0x13   :  { %67 = vrot.lane.b32.xlu1 %v40_v10, %s201_s23  ;;  %v30_v27 = vld [vmem:[#allocation2 + $0x8] sm:$0xff] }
  0x19   :  { %47 = vrot.lane.b32.xlu2 %v34_v11, %s200_s22 }
  0x1a   :  { %61 = vrot.lane.b32.xlu0 %v37_v12, %s201_s23 }
  0x1b   :  { %63 = vrot.lane.b32.xlu1 %v38_v13, %s201_s23 }
  0x6b   :  { %v46_v20 = vpop.permute.xlu2 %45 }
  0x6c   :  { %v73_v30 = vsel %vm24_vm0, %v29_v28, %v46_v20 }
  0x73   :  { %v48_v26 = vpop.permute.xlu2 %47 }
  0x74   :  { %v74_v29 = vsel %vm24_vm0, %v30_v27, %v48_v26 }
  0x7c   :  { %v50_v16 = vpop.permute.xlu0 %49 }
  0x7d   :  { %v66_v17 = vpop.permute.xlu1 %65  ;;  %v75_v18 = vsel %vm24_vm0, %v31_v15, %v50_v16 }
  0x7e   :  { %v80_v19 = vsel %vm77_vm3, %v75_v18, %v66_v17 }
  0x7f   :  { %159 = vmatmul.msk.f32.vlgmr.msra.gmra.mxu2 %vm88_vm4, %v80_v19 }
  0x84   :  { %v52_v22 = vpop.permute.xlu0 %51 }
  0x85   :  { %v76_v23 = vsel %vm24_vm0, %v32_v21, %v52_v22  ;;  %v68_v24 = vpop.permute.xlu1 %67 }
  0x86   :  { %v81_v25 = vsel %vm77_vm3, %v76_v23, %v68_v24 }
  0x87   :  { %160 = vmatmul.msk.f32.vlgmr.msra.gmra.mxu3 %vm88_vm4, %v81_v25 }
  0x8c   :  { %v62_v31 = vpop.permute.xlu0 %61 }
  0x8d   :  { %v64_v32 = vpop.permute.xlu1 %63  ;;  %v78_v33 = vsel %vm77_vm3, %v73_v30, %v62_v31 }
  0x8e   :  { %157 = vmatmul.msk.f32.vlgmr.msra.gmra.mxu0 %vm88_vm4, %v78_v33  ;;  %v79_v34 = vsel %vm77_vm3, %v74_v29, %v64_v32 }
  0x8f   :  { %158 = vmatmul.msk.f32.vlgmr.msra.gmra.mxu1 %vm88_vm4, %v79_v34 }
 0x102   :  { %v128_v36 = vpop.f32.mrf.mxu2 }
 0x103   :  { %v129_v37 = vadd.f32 %v172_v35, %v128_v36 }
 0x105   :  { %136 = vst [vmem:[#allocation3 + $0x10] sm:$0xff] %v129_v37 }
 0x10a   :  { %v131_v38 = vpop.f32.mrf.mxu3 }
 0x10b   :  { %v132_v39 = vadd.f32 %v172_v35, %v131_v38  ;;  %v122_v40 = vpop.f32.mrf.mxu0 }
 0x10c   :  { %v123_v41 = vadd.f32 %v172_v35, %v122_v40  ;;  %v125_v42 = vpop.f32.mrf.mxu1 }
 0x10d   :  { %137 = vst [vmem:[#allocation3 + $0x18] sm:$0xff] %v132_v39  ;;  %v126_v43 = vadd.f32 %v172_v35, %v125_v42 }
 0x10e   :  { %134 = vst [vmem:[#allocation3] sm:$0xff] %v123_v41 }
 0x10f   :  { %135 = vst [vmem:[#allocation3 + $0x8] sm:$0xff] %v126_v43 }
 0x110   :  { %150 = dma.vmem_to_hbm [thread:$0]  %s143_s27, 512, %s145_s30, [#allocation4], %s203_s2, %s203_s2, %s201_s23  }
 0x111   :  { %197 = dma.done.wait [#allocation4], 512  }
 0x112   :  { %198 = vsyncadd [#allocation4], 4294966784 }
 0x113   :  { %155 = vsyncpa [#allocation4], 1 }

</bundles_post_ra>
